<compile_context>
chip_gen: v7x
topology: tpu7x:2x2x1
jax: 0.10.0
libtpu: 0.0.40
codegen_flags: <defaults>
</compile_context>

<pallas_src>
import functools

import jax
import jax.numpy as jnp
from jax.experimental import pallas as pl
from jax.experimental.pallas import tpu as pltpu

NEG_SLOPE = 0.01     # torch.nn.LeakyReLU default
TB_MAX = 2048        # batch-tile cap: ~10 MiB live per step, fits v7x's 64 MiB VMEM
VMEM_LIMIT = 64 * 1024 * 1024


def _round_up(n, m):
    return ((n + m - 1) // m) * m


def _leaky_relu(v):
    return jnp.where(v > 0, v, NEG_SLOPE * v)


def mlp_base_kernel(x_ref,
                    w1_ref, b1_ref,
                    w2_ref, b2_ref,
                    w3_ref, b3_ref,
                    w4_ref, b4_ref,
                    o_ref):
    # x streams in as f32 at its natural K (=18) and is cast to bf16 here;
    # weights are bf16; every dot accumulates in f32 on the MXU.
    x = x_ref[...].astype(jnp.bfloat16)

    h = jnp.dot(x, w1_ref[...], preferred_element_type=jnp.float32) + b1_ref[...]
    h = _leaky_relu(h)

    h = jnp.dot(h.astype(jnp.bfloat16), w2_ref[...],
                preferred_element_type=jnp.float32) + b2_ref[...]
    h = _leaky_relu(h)

    h = jnp.dot(h.astype(jnp.bfloat16), w3_ref[...],
                preferred_element_type=jnp.float32) + b3_ref[...]
    h = _leaky_relu(h)

    h = jnp.dot(h.astype(jnp.bfloat16), w4_ref[...],
                preferred_element_type=jnp.float32) + b4_ref[...]

    o_ref[...] = h.astype(o_ref.dtype)


def prepare_params(params):
    """One-time host-side prep: cast weights to bf16 (MXU operand dtype).
    No padding — layer-1 keeps its natural (obs+reward, 128) shape.
    Biases stay f32 with shape [1, out]."""
    return [(w.astype(jnp.bfloat16), b.astype(jnp.float32)) for w, b in params]


@functools.partial(jax.jit, static_argnames=("out_dtype",))
def mlp_base_forward(x, prepared_params, out_dtype=jnp.bfloat16):
    """x: [B, obs+reward] float32. prepared_params: output of prepare_params.

    out_dtype defaults to bf16 (accumulation is f32 inside the kernel); pass
    jnp.float32 if the consumer needs f32 activations.
    """
    B, d_in = x.shape
    out_dim = prepared_params[-1][0].shape[1]

    # Adaptive batch tile: multiple of 8 (sublane), aim for >=4 grid steps so
    # the "parallel" axis can be sharded across v7x's two TensorCores, cap at
    # TB_MAX for VMEM on all generations.  No batch padding: Pallas masks the
    # ragged trailing block.
    TB = min(TB_MAX, max(8, _round_up(pl.cdiv(B, 4), 8)))
    grid = (pl.cdiv(B, TB),)

    # Streaming specs for x / out (batch-tiled); constant index_map for the
    # tiny weights & biases so they are DMA'd into VMEM once and stay resident.
    x_spec = pl.BlockSpec((TB, d_in), lambda i: (i, 0))
    out_spec = pl.BlockSpec((TB, out_dim), lambda i: (i, 0))

    flat_args = [x]
    in_specs = [x_spec]
    for w, b in prepared_params:
        flat_args += [w, b]
        in_specs += [pl.BlockSpec(w.shape, lambda i: (0, 0)),
                     pl.BlockSpec(b.shape, lambda i: (0, 0))]

    # Advisory cost hint for the XLA scheduler.
    flops = 2 * B * sum(w.shape[0] * w.shape[1] for w, _ in prepared_params)
    bytes_accessed = (
        x.size * x.dtype.itemsize
        + sum(w.size * 2 + b.size * 4 for w, b in prepared_params)
        + B * out_dim * jnp.dtype(out_dtype).itemsize)
    cost = pl.CostEstimate(flops=flops, transcendentals=0,
                           bytes_accessed=bytes_accessed)

    out = pl.pallas_call(
        mlp_base_kernel,
        out_shape=jax.ShapeDtypeStruct((B, out_dim), out_dtype),
        grid=grid,
        in_specs=in_specs,
        out_specs=out_spec,
        compiler_params=pltpu.CompilerParams(
            dimension_semantics=("parallel",),
            vmem_limit_bytes=VMEM_LIMIT),
        cost_estimate=cost,
    )(*flat_args)

    return out


def init_params(key, observation_shape, reward_shape):
    """Deterministic synthetic init; shapes match the PyTorch module."""
    dims = [(observation_shape + reward_shape, 128),
            (128, 256),
            (256, 256),
            (256, 256)]
    params = []
    for (d_in, d_out) in dims:
        key, kw, kb = jax.random.split(key, 3)
        bound = 1.0 / jnp.sqrt(jnp.float32(d_in))
        w = jax.random.uniform(kw, (d_in, d_out), jnp.float32, -bound, bound)
        b = jax.random.uniform(kb, (1, d_out), jnp.float32, -bound, bound)
        params.append((w, b))
    return params


def reference_forward(x, params):
    """Mirrors the kernel's bf16-operand / f32-accumulate math."""
    h = x
    for i, (w, b) in enumerate(params):
        h = jnp.dot(h.astype(jnp.bfloat16), w.astype(jnp.bfloat16),
                    preferred_element_type=jnp.float32) + b
        if i < len(params) - 1:
            h = jnp.where(h > 0, h, NEG_SLOPE * h)
    return h


if __name__ == "__main__":
    observation_shape = 16
    action_shape = 4   # unused in forward (matches the PyTorch module)
    reward_shape = 2
    batch = 8          # NOTE: at B=8 the op is latency-bound; batch more
                       # actor steps per call in real deployments.

    key = jax.random.PRNGKey(0)
    key, kx = jax.random.split(key)
    x = jax.random.normal(kx, (batch, observation_shape + reward_shape),
                          jnp.float32)

    params = init_params(key, observation_shape, reward_shape)
    prepared = prepare_params(params)

    out = mlp_base_forward(x, prepared)           # bf16 output by default
    out = jax.block_until_ready(out)

    ref = reference_forward(x, params)
    # Compare at the kernel's output precision (bf16 store of f32 accumulator).
    ref_q = ref.astype(jnp.bfloat16).astype(jnp.float32)

    assert out.shape == (batch, 256)
    assert out.dtype == jnp.bfloat16
    assert jnp.allclose(out.astype(jnp.float32), ref_q, atol=2e-2, rtol=2e-2), \
        "mismatch vs JAX reference"

    print("KERNEL_OK")
</pallas_src>

<mosaic_0001>
module attributes {stable_mosaic.version = 11 : i64} {
  func.func @mlp_base_kernel(%arg0: i32, %arg1: memref<8x18xf32, #tpu.memory_space<vmem>>, %arg2: memref<18x128xbf16, #tpu.memory_space<vmem>>, %arg3: memref<1x128xf32, #tpu.memory_space<vmem>>, %arg4: memref<128x256xbf16, #tpu.memory_space<vmem>>, %arg5: memref<1x256xf32, #tpu.memory_space<vmem>>, %arg6: memref<256x256xbf16, #tpu.memory_space<vmem>>, %arg7: memref<1x256xf32, #tpu.memory_space<vmem>>, %arg8: memref<256x256xbf16, #tpu.memory_space<vmem>>, %arg9: memref<1x256xf32, #tpu.memory_space<vmem>>, %arg10: memref<8x256xbf16, #tpu.memory_space<vmem>>) attributes {dimension_semantics = [#tpu.dimension_semantics<parallel>], iteration_bounds = array<i64: 1>, scalar_prefetch = 0 : i64, scratch_operands = 0 : i64, tpu.core_type = #tpu.core_type<tc>, window_params = [{transform_indices = @transform_0, window_bounds = array<i64: 8, 18>}, {pipeline_mode = #tpu.pipeline_mode<synchronous>, transform_indices = @transform_1, window_bounds = array<i64: 18, 128>}, {pipeline_mode = #tpu.pipeline_mode<synchronous>, transform_indices = @transform_2, window_bounds = array<i64: 1, 128>}, {pipeline_mode = #tpu.pipeline_mode<synchronous>, transform_indices = @transform_3, window_bounds = array<i64: 128, 256>}, {pipeline_mode = #tpu.pipeline_mode<synchronous>, transform_indices = @transform_4, window_bounds = array<i64: 1, 256>}, {pipeline_mode = #tpu.pipeline_mode<synchronous>, transform_indices = @transform_5, window_bounds = array<i64: 256, 256>}, {pipeline_mode = #tpu.pipeline_mode<synchronous>, transform_indices = @transform_6, window_bounds = array<i64: 1, 256>}, {pipeline_mode = #tpu.pipeline_mode<synchronous>, transform_indices = @transform_7, window_bounds = array<i64: 256, 256>}, {pipeline_mode = #tpu.pipeline_mode<synchronous>, transform_indices = @transform_8, window_bounds = array<i64: 1, 256>}, {transform_indices = @transform_9, window_bounds = array<i64: 8, 256>}]} {
    %c0 = arith.constant 0 : index
    %c0_0 = arith.constant 0 : index
    %0 = vector.load %arg1[%c0, %c0_0] : memref<8x18xf32, #tpu.memory_space<vmem>>, vector<8x18xf32>
    %1 = arith.truncf %0 : vector<8x18xf32> to vector<8x18xbf16>
    %c0_1 = arith.constant 0 : index
    %c0_2 = arith.constant 0 : index
    %2 = vector.load %arg2[%c0_1, %c0_2] : memref<18x128xbf16, #tpu.memory_space<vmem>>, vector<18x128xbf16>
    %cst = arith.constant dense<0.000000e+00> : vector<8x128xf32>
    %3 = tpu.matmul %1, %2, %cst {dimension_numbers = #tpu.dot_dimension_numbers<[1], [0], [0], [1], [0, 0, 1, 1], [], []>} : vector<8x18xbf16>, vector<18x128xbf16>, vector<8x128xf32> -> vector<8x128xf32>
    %c0_3 = arith.constant 0 : index
    %c0_4 = arith.constant 0 : index
    %4 = vector.load %arg3[%c0_3, %c0_4] : memref<1x128xf32, #tpu.memory_space<vmem>>, vector<1x128xf32>
    %5 = vector.broadcast %4 : vector<1x128xf32> to vector<8x128xf32>
    %6 = arith.addf %3, %5 : vector<8x128xf32>
    %cst_5 = arith.constant 0.000000e+00 : f32
    %7 = vector.broadcast %cst_5 : f32 to vector<8x128xf32>
    %8 = arith.cmpf ogt, %6, %7 : vector<8x128xf32>
    %cst_6 = arith.constant 0.00999999977 : f32
    %9 = vector.broadcast %cst_6 : f32 to vector<8x128xf32>
    %10 = arith.mulf %9, %6 : vector<8x128xf32>
    %11 = arith.select %8, %6, %10 : vector<8x128xi1>, vector<8x128xf32>
    %12 = arith.truncf %11 : vector<8x128xf32> to vector<8x128xbf16>
    %c0_7 = arith.constant 0 : index
    %c0_8 = arith.constant 0 : index
    %13 = vector.load %arg4[%c0_7, %c0_8] : memref<128x256xbf16, #tpu.memory_space<vmem>>, vector<128x256xbf16>
    %cst_9 = arith.constant dense<0.000000e+00> : vector<8x256xf32>
    %14 = tpu.matmul %12, %13, %cst_9 {dimension_numbers = #tpu.dot_dimension_numbers<[1], [0], [0], [1], [0, 0, 1, 1], [], []>} : vector<8x128xbf16>, vector<128x256xbf16>, vector<8x256xf32> -> vector<8x256xf32>
    %c0_10 = arith.constant 0 : index
    %c0_11 = arith.constant 0 : index
    %15 = vector.load %arg5[%c0_10, %c0_11] : memref<1x256xf32, #tpu.memory_space<vmem>>, vector<1x256xf32>
    %16 = vector.broadcast %15 : vector<1x256xf32> to vector<8x256xf32>
    %17 = arith.addf %14, %16 : vector<8x256xf32>
    %cst_12 = arith.constant 0.000000e+00 : f32
    %18 = vector.broadcast %cst_12 : f32 to vector<8x256xf32>
    %19 = arith.cmpf ogt, %17, %18 : vector<8x256xf32>
    %cst_13 = arith.constant 0.00999999977 : f32
    %20 = vector.broadcast %cst_13 : f32 to vector<8x256xf32>
    %21 = arith.mulf %20, %17 : vector<8x256xf32>
    %22 = arith.select %19, %17, %21 : vector<8x256xi1>, vector<8x256xf32>
    %23 = arith.truncf %22 : vector<8x256xf32> to vector<8x256xbf16>
    %c0_14 = arith.constant 0 : index
    %c0_15 = arith.constant 0 : index
    %24 = vector.load %arg6[%c0_14, %c0_15] : memref<256x256xbf16, #tpu.memory_space<vmem>>, vector<256x256xbf16>
    %cst_16 = arith.constant dense<0.000000e+00> : vector<8x256xf32>
    %25 = tpu.matmul %23, %24, %cst_16 {dimension_numbers = #tpu.dot_dimension_numbers<[1], [0], [0], [1], [0, 0, 1, 1], [], []>} : vector<8x256xbf16>, vector<256x256xbf16>, vector<8x256xf32> -> vector<8x256xf32>
    %c0_17 = arith.constant 0 : index
    %c0_18 = arith.constant 0 : index
    %26 = vector.load %arg7[%c0_17, %c0_18] : memref<1x256xf32, #tpu.memory_space<vmem>>, vector<1x256xf32>
    %27 = vector.broadcast %26 : vector<1x256xf32> to vector<8x256xf32>
    %28 = arith.addf %25, %27 : vector<8x256xf32>
    %cst_19 = arith.constant 0.000000e+00 : f32
    %29 = vector.broadcast %cst_19 : f32 to vector<8x256xf32>
    %30 = arith.cmpf ogt, %28, %29 : vector<8x256xf32>
    %cst_20 = arith.constant 0.00999999977 : f32
    %31 = vector.broadcast %cst_20 : f32 to vector<8x256xf32>
    %32 = arith.mulf %31, %28 : vector<8x256xf32>
    %33 = arith.select %30, %28, %32 : vector<8x256xi1>, vector<8x256xf32>
    %34 = arith.truncf %33 : vector<8x256xf32> to vector<8x256xbf16>
    %c0_21 = arith.constant 0 : index
    %c0_22 = arith.constant 0 : index
    %35 = vector.load %arg8[%c0_21, %c0_22] : memref<256x256xbf16, #tpu.memory_space<vmem>>, vector<256x256xbf16>
    %cst_23 = arith.constant dense<0.000000e+00> : vector<8x256xf32>
    %36 = tpu.matmul %34, %35, %cst_23 {dimension_numbers = #tpu.dot_dimension_numbers<[1], [0], [0], [1], [0, 0, 1, 1], [], []>} : vector<8x256xbf16>, vector<256x256xbf16>, vector<8x256xf32> -> vector<8x256xf32>
    %c0_24 = arith.constant 0 : index
    %c0_25 = arith.constant 0 : index
    %37 = vector.load %arg9[%c0_24, %c0_25] : memref<1x256xf32, #tpu.memory_space<vmem>>, vector<1x256xf32>
    %38 = vector.broadcast %37 : vector<1x256xf32> to vector<8x256xf32>
    %39 = arith.addf %36, %38 : vector<8x256xf32>
    %40 = arith.truncf %39 : vector<8x256xf32> to vector<8x256xbf16>
    %c0_26 = arith.constant 0 : index
    %c0_27 = arith.constant 0 : index
    %41 = vector.load %arg10[%c0_26, %c0_27] : memref<8x256xbf16, #tpu.memory_space<vmem>>, vector<8x256xbf16>
    tpu.vector_store %arg10[%c0_26, %c0_27], %40 {strides = array<i32>} : memref<8x256xbf16, #tpu.memory_space<vmem>>, vector<8x256xbf16>,
    return
  }
  func.func @transform_0(%arg0: i32) -> (i32, i32) {
    %c0_i32 = arith.constant 0 : i32
    %c0_i32_0 = arith.constant 0 : i32
    return %arg0, %c0_i32 : i32, i32
  }
  func.func @transform_1(%arg0: i32) -> (i32, i32) {
    %c0_i32 = arith.constant 0 : i32
    %c0_i32_0 = arith.constant 0 : i32
    %c0_i32_1 = arith.constant 0 : i32
    return %c0_i32, %c0_i32_0 : i32, i32
  }
  func.func @transform_2(%arg0: i32) -> (i32, i32) {
    %c0_i32 = arith.constant 0 : i32
    %c0_i32_0 = arith.constant 0 : i32
    %c0_i32_1 = arith.constant 0 : i32
    return %c0_i32, %c0_i32_0 : i32, i32
  }
  func.func @transform_3(%arg0: i32) -> (i32, i32) {
    %c0_i32 = arith.constant 0 : i32
    %c0_i32_0 = arith.constant 0 : i32
    %c0_i32_1 = arith.constant 0 : i32
    return %c0_i32, %c0_i32_0 : i32, i32
  }
  func.func @transform_4(%arg0: i32) -> (i32, i32) {
    %c0_i32 = arith.constant 0 : i32
    %c0_i32_0 = arith.constant 0 : i32
    %c0_i32_1 = arith.constant 0 : i32
    return %c0_i32, %c0_i32_0 : i32, i32
  }
  func.func @transform_5(%arg0: i32) -> (i32, i32) {
    %c0_i32 = arith.constant 0 : i32
    %c0_i32_0 = arith.constant 0 : i32
    %c0_i32_1 = arith.constant 0 : i32
    return %c0_i32, %c0_i32_0 : i32, i32
  }
  func.func @transform_6(%arg0: i32) -> (i32, i32) {
    %c0_i32 = arith.constant 0 : i32
    %c0_i32_0 = arith.constant 0 : i32
    %c0_i32_1 = arith.constant 0 : i32
    return %c0_i32, %c0_i32_0 : i32, i32
  }
  func.func @transform_7(%arg0: i32) -> (i32, i32) {
    %c0_i32 = arith.constant 0 : i32
    %c0_i32_0 = arith.constant 0 : i32
    %c0_i32_1 = arith.constant 0 : i32
    return %c0_i32, %c0_i32_0 : i32, i32
  }
  func.func @transform_8(%arg0: i32) -> (i32, i32) {
    %c0_i32 = arith.constant 0 : i32
    %c0_i32_0 = arith.constant 0 : i32
    %c0_i32_1 = arith.constant 0 : i32
    return %c0_i32, %c0_i32_0 : i32, i32
  }
  func.func @transform_9(%arg0: i32) -> (i32, i32) {
    %c0_i32 = arith.constant 0 : i32
    %c0_i32_0 = arith.constant 0 : i32
    return %arg0, %c0_i32 : i32, i32
  }
}

</mosaic_0001>

<bundles_post_ra>
// kernel: mlp_base_forward.1
= control target key start
LH: loop header
LB: loop body
LE: loop exit
PB: predicated region body
PF: predicated region fallthrough
CT: control target
= control target key end

     0   :  { %14 = vsyncpa [#allocation3], 0  ;;  %s1573_s0 = inlined_call_operand.hbm [shape: f32[8,18], index: 0, kind: input, shape index: {}]   ;;  %s1574_s1 = inlined_call_operand.hbm [shape: bf16[18,128], index: 1, kind: input, shape index: {}]   ;;  %s1575_s2 = inlined_call_operand.hbm [shape: f32[1,128], index: 2, kind: input, shape index: {}]   ;;  %s1576_s3 = inlined_call_operand.hbm [shape: bf16[128,256], index: 3, kind: input, shape index: {}]   ;;  %s1577_s4 = inlined_call_operand.hbm [shape: f32[1,256], index: 4, kind: input, shape index: {}]   ;;  %s1578_s5 = inlined_call_operand.hbm [shape: bf16[256,256], index: 5, kind: input, shape index: {}]   ;;  %s1579_s6 = inlined_call_operand.hbm [shape: f32[1,256], index: 6, kind: input, shape index: {}]   ;;  %s1580_s7 = inlined_call_operand.hbm [shape: bf16[256,256], index: 7, kind: input, shape index: {}]   ;;  %s1581_s8 = inlined_call_operand.hbm [shape: f32[1,256], index: 8, kind: input, shape index: {}]   ;;  %s1582_s9 = inlined_call_operand.hbm [shape: bf16[8,256], index: 9, kind: output, shape index: {}]  }
   0x1   :  { %15 = vsyncpa [#allocation6], 0 }
   0x2   :  { %16 = vsyncpa [#allocation9], 0 }
   0x3   :  { %17 = vsyncpa [#allocation12], 0 }
   0x4   :  { %18 = vsyncpa [#allocation15], 0 }
   0x5   :  { %19 = vsyncpa [#allocation4], 0  ;;  %s1370_s30 = smov [#allocation5]   ;;  %s1138_s13 = scalar_lea.hbm %s1574_s1, 192 }
   0x6   :  { %s35_s10 = sshll.u32 %s1370_s30, 4  ;;  %p1139_p0 = scmp.ne.s32.totalorder %s1574_s1, %s1138_s13  ;;  %s36_s10 = int_to_ptr.vmem [resolvable:$true] %s35_s10 }
   0x7   :  { %p1142_p1 = scmp.lt.u32.totalorder %s1138_s13, %s1574_s1 }
   0x9   :  { %p1144_p2 = pnand %p1142_p1, %p1139_p0 }
   0xb   :  { %1147 = shalt.err (!%p1144_p2)
}
   0xc   :  { %s1148_s18 = scalar_lea.vmem %s36_s10, 192  ;;  %p1153_p4 = scmp.lt.s32.totalorder %s36_s10, %s36_s10 }
   0xd   :  { %p1149_p3 = scmp.ne.s32.totalorder %s36_s10, %s1148_s18  ;;  %p1154_p5 = scmp.lt.s32.totalorder %s1148_s18, %s1148_s18 }
   0xf   :  { %p1155_p6 = por %p1154_p5, %p1153_p4 }
  0x11   :  { %p1156_p7 = pnand %p1155_p6, %p1149_p3 }
  0x13   :  { %1159 = shalt.err (!%p1156_p7)
}
  0x14   :  { %s1371_s19 = smov 64   ;;  %s1372_s20 = smov 4  }
  0x15   :  { %41 = dma.hbm_to_vmem [thread:$0]  %s1574_s1, 192, %s36_s10, [#allocation6], %s1371_s19, %s1371_s19, %s1372_s20  }
  0x16   :  { %s1373_s23 = smov [#allocation8]   ;;  %s1160_s27 = scalar_lea.hbm %s1576_s3, 2048 }
  0x17   :  { %s57_s24 = sshll.u32 %s1373_s23, 4  ;;  %p1161_p8 = scmp.ne.s32.totalorder %s1576_s3, %s1160_s27  ;;  %s58_s24 = int_to_ptr.vmem [resolvable:$true] %s57_s24 }
  0x18   :  { %p1164_p9 = scmp.lt.u32.totalorder %s1160_s27, %s1576_s3 }
  0x1a   :  { %p1166_p10 = pnand %p1164_p9, %p1161_p8 }
  0x1c   :  { %1169 = shalt.err (!%p1166_p10)
}
  0x1d   :  { %s1170_s12 = scalar_lea.vmem %s58_s24, 2048  ;;  %p1175_p12 = scmp.lt.s32.totalorder %s58_s24, %s58_s24 }
  0x1e   :  { %p1171_p11 = scmp.ne.s32.totalorder %s58_s24, %s1170_s12  ;;  %p1176_p13 = scmp.lt.s32.totalorder %s1170_s12, %s1170_s12 }
  0x20   :  { %p1177_p0 = por %p1176_p13, %p1175_p12 }
  0x22   :  { %p1178_p1 = pnand %p1177_p0, %p1171_p11 }
  0x24   :  { %1181 = shalt.err (!%p1178_p1)
}
  0x25   :  { %s1374_s1 = smov 128   ;;  %s1375_s10 = smov 8  }
  0x26   :  { %63 = dma.hbm_to_vmem [thread:$0]  %s1576_s3, 2048, %s58_s24, [#allocation9], %s1374_s1, %s1374_s1, %s1375_s10  }
  0x27   :  { %s1376_s15 = smov [#allocation11]   ;;  %s1377_s17 = smov [#allocation14]  }
  0x28   :  { %s79_s16 = sshll.u32 %s1376_s15, 4  ;;  %s101_s18 = sshll.u32 %s1377_s17, 4  ;;  %s80_s16 = int_to_ptr.vmem [resolvable:$true] %s79_s16  ;;  %s1464_s18 = int_to_ptr.vmem [resolvable:$true] %s101_s18 }
  0x29   :  { %s1182_s21 = scalar_lea.hbm %s1578_s5, 4096 }
  0x2a   :  { %p1183_p2 = scmp.ne.s32.totalorder %s1578_s5, %s1182_s21  ;;  %p1186_p3 = scmp.lt.u32.totalorder %s1182_s21, %s1578_s5 }
  0x2c   :  { %p1188_p4 = pnand %p1186_p3, %p1183_p2 }
  0x2e   :  { %1191 = shalt.err (!%p1188_p4)
}
  0x2f   :  { %s1192_s3 = scalar_lea.vmem %s80_s16, 4096  ;;  %p1197_p6 = scmp.lt.s32.totalorder %s80_s16, %s80_s16 }
  0x30   :  { %p1193_p5 = scmp.ne.s32.totalorder %s80_s16, %s1192_s3  ;;  %p1198_p7 = scmp.lt.s32.totalorder %s1192_s3, %s1192_s3 }
  0x32   :  { %p1199_p8 = por %p1198_p7, %p1197_p6 }
  0x34   :  { %p1200_p9 = pnand %p1199_p8, %p1193_p5 }
  0x36   :  { %1203 = shalt.err (!%p1200_p9)
}
  0x37   :  { %85 = dma.hbm_to_vmem [thread:$0]  %s1578_s5, 4096, %s80_s16, [#allocation12], %s1374_s1, %s1374_s1, %s1375_s10  }
  0x38   :  { %s1204_s30 = scalar_lea.hbm %s1580_s7, 4096 }
  0x39   :  { %p1205_p10 = scmp.ne.s32.totalorder %s1580_s7, %s1204_s30  ;;  %p1208_p11 = scmp.lt.u32.totalorder %s1204_s30, %s1580_s7 }
  0x3b   :  { %p1210_p12 = pnand %p1208_p11, %p1205_p10 }
  0x3d   :  { %1213 = shalt.err (!%p1210_p12)
}
  0x3e   :  { %s1214_s15 = scalar_lea.vmem %s1464_s18, 4096  ;;  %p1219_p0 = scmp.lt.s32.totalorder %s1464_s18, %s1464_s18 }
  0x3f   :  { %p1215_p13 = scmp.ne.s32.totalorder %s1464_s18, %s1214_s15  ;;  %p1220_p1 = scmp.lt.s32.totalorder %s1214_s15, %s1214_s15 }
  0x41   :  { %p1221_p2 = por %p1220_p1, %p1219_p0 }
  0x43   :  { %p1222_p3 = pnand %p1221_p2, %p1215_p13 }
  0x45   :  { %1225 = shalt.err (!%p1222_p3)
}
  0x46   :  { %107 = dma.hbm_to_vmem [thread:$0]  %s1580_s7, 4096, %s1464_s18, [#allocation15], %s1374_s1, %s1374_s1, %s1375_s10  }
  0x47   :  { %s1378_s17 = smov [#allocation2]   ;;  %s1379_s20 = smov [#allocation7]  }
  0x48   :  { %s26_s19 = sshll.u32 %s1378_s17, 4  ;;  %s48_s21 = sshll.u32 %s1379_s20, 4  ;;  %s27_s19 = int_to_ptr.vmem [resolvable:$true] %s26_s19  ;;  %s49_s21 = int_to_ptr.vmem [resolvable:$true] %s48_s21 }
  0x49   :  { %s1226_s25 = scalar_lea.hbm %s1573_s0, 128 }
  0x4a   :  { %p1227_p4 = scmp.ne.s32.totalorder %s1573_s0, %s1226_s25  ;;  %p1230_p5 = scmp.lt.u32.totalorder %s1226_s25, %s1573_s0 }
  0x4c   :  { %p1232_p6 = pnand %p1230_p5, %p1227_p4 }
  0x4e   :  { %1235 = shalt.err (!%p1232_p6)
}
  0x4f   :  { %s1236_s7 = scalar_lea.vmem %s27_s19, 128  ;;  %p1241_p8 = scmp.lt.s32.totalorder %s27_s19, %s27_s19 }
  0x50   :  { %p1237_p7 = scmp.ne.s32.totalorder %s27_s19, %s1236_s7  ;;  %p1242_p9 = scmp.lt.s32.totalorder %s1236_s7, %s1236_s7 }
  0x52   :  { %p1243_p10 = por %p1242_p9, %p1241_p8 }
  0x54   :  { %p1244_p11 = pnand %p1243_p10, %p1237_p7 }
  0x56   :  { %1247 = shalt.err (!%p1244_p11)
}
  0x57   :  { %29 = dma.hbm_to_vmem [thread:$0]  %s1573_s0, 128, %s27_s19, [#allocation3]  }
  0x58   :  { %s1248_s29 = scalar_lea.hbm %s1575_s2, 16 }
  0x59   :  { %p1249_p12 = scmp.ne.s32.totalorder %s1575_s2, %s1248_s29  ;;  %p1252_p13 = scmp.lt.u32.totalorder %s1248_s29, %s1575_s2 }
  0x5b   :  { %p1254_p0 = pnand %p1252_p13, %p1249_p12 }
  0x5d   :  { %1257 = shalt.err (!%p1254_p0)
}
  0x5e   :  { %s1258_s14 = scalar_lea.vmem %s49_s21, 16  ;;  %s1262_s15 = scalar_lea.vmem %s49_s21, 32 }
  0x5f   :  { %p1259_p1 = scmp.ne.s32.totalorder %s49_s21, %s1258_s14  ;;  %p1263_p2 = scmp.lt.s32.totalorder %s49_s21, %s49_s21 }
  0x60   :  { %p1264_p3 = scmp.lt.s32.totalorder %s1262_s15, %s1258_s14 }
  0x62   :  { %p1265_p4 = por %p1264_p3, %p1263_p2 }
  0x64   :  { %p1266_p5 = pnand %p1265_p4, %p1259_p1 }
  0x66   :  { %1269 = shalt.err (!%p1266_p5)
}
  0x67   :  { %51 = dma.hbm_to_vmem [thread:$0]  %s1575_s2, 16, %s49_s21, [#allocation6]  }
  0x68   :  { %s1380_s16 = smov [#allocation10]   ;;  %s1381_s19 = smov [#allocation13]  }
  0x69   :  { %s70_s17 = sshll.u32 %s1380_s16, 4  ;;  %s92_s20 = sshll.u32 %s1381_s19, 4  ;;  %s71_s17 = int_to_ptr.vmem [resolvable:$true] %s70_s17  ;;  %s93_s20 = int_to_ptr.vmem [resolvable:$true] %s92_s20 }
  0x6a   :  { %s1270_s25 = scalar_lea.hbm %s1577_s4, 32 }
  0x6b   :  { %p1271_p6 = scmp.ne.s32.totalorder %s1577_s4, %s1270_s25  ;;  %p1274_p7 = scmp.lt.u32.totalorder %s1270_s25, %s1577_s4 }
  0x6d   :  { %p1276_p8 = pnand %p1274_p7, %p1271_p6 }
  0x6f   :  { %1279 = shalt.err (!%p1276_p8)
}
  0x70   :  { %s1280_s2 = scalar_lea.vmem %s71_s17, 32  ;;  %p1285_p10 = scmp.lt.s32.totalorder %s71_s17, %s71_s17 }
  0x71   :  { %p1281_p9 = scmp.ne.s32.totalorder %s71_s17, %s1280_s2  ;;  %p1286_p11 = scmp.lt.s32.totalorder %s1280_s2, %s1280_s2 }
  0x73   :  { %p1287_p12 = por %p1286_p11, %p1285_p10 }
  0x75   :  { %p1288_p13 = pnand %p1287_p12, %p1281_p9 }
  0x77   :  { %1291 = shalt.err (!%p1288_p13)
}
  0x78   :  { %73 = dma.hbm_to_vmem [thread:$0]  %s1577_s4, 32, %s71_s17, [#allocation9]  }
  0x79   :  { %s1292_s18 = scalar_lea.hbm %s1579_s6, 32 }
  0x7a   :  { %p1293_p0 = scmp.ne.s32.totalorder %s1579_s6, %s1292_s18  ;;  %p1296_p1 = scmp.lt.u32.totalorder %s1292_s18, %s1579_s6 }
  0x7c   :  { %p1298_p2 = pnand %p1296_p1, %p1293_p0 }
  0x7e   :  { %1301 = shalt.err (!%p1298_p2)
}
  0x7f   :  { %s1302_s12 = scalar_lea.vmem %s93_s20, 32  ;;  %p1307_p4 = scmp.lt.s32.totalorder %s93_s20, %s93_s20 }
  0x80   :  { %p1303_p3 = scmp.ne.s32.totalorder %s93_s20, %s1302_s12  ;;  %p1308_p5 = scmp.lt.s32.totalorder %s1302_s12, %s1302_s12 }
  0x82   :  { %p1309_p6 = por %p1308_p5, %p1307_p4 }
  0x84   :  { %p1310_p7 = pnand %p1309_p6, %p1303_p3 }
  0x86   :  { %1313 = shalt.err (!%p1310_p7)
}
  0x87   :  { %95 = dma.hbm_to_vmem [thread:$0]  %s1579_s6, 32, %s93_s20, [#allocation12]  }
  0x88   :  { %s1382_s14 = smov [#allocation16]   ;;  %s1314_s16 = scalar_lea.hbm %s1581_s8, 32 }
  0x89   :  { %s114_s15 = sshll.u32 %s1382_s14, 4  ;;  %p1315_p8 = scmp.ne.s32.totalorder %s1581_s8, %s1314_s16  ;;  %s115_s15 = int_to_ptr.vmem [resolvable:$true] %s114_s15 }
  0x8a   :  { %p1318_p9 = scmp.lt.u32.totalorder %s1314_s16, %s1581_s8 }
  0x8c   :  { %p1320_p10 = pnand %p1318_p9, %p1315_p8 }
  0x8e   :  { %1323 = shalt.err (!%p1320_p10)
}
  0x8f   :  { %s1324_s25 = scalar_lea.vmem %s115_s15, 32  ;;  %p1329_p12 = scmp.lt.s32.totalorder %s115_s15, %s115_s15 }
  0x90   :  { %p1325_p11 = scmp.ne.s32.totalorder %s115_s15, %s1324_s25  ;;  %p1330_p13 = scmp.lt.s32.totalorder %s1324_s25, %s1324_s25 }
  0x92   :  { %p1331_p0 = por %p1330_p13, %p1329_p12 }
  0x94   :  { %p1332_p1 = pnand %p1331_p0, %p1325_p11 }
  0x96   :  { %1335 = shalt.err (!%p1332_p1)
}
  0x97   :  { %117 = dma.hbm_to_vmem [thread:$0]  %s1581_s8, 32, %s115_s15, [#allocation15]  }
  0x98   :  { %1358 = dma.done.wait [#allocation3], 128  }
  0x99   :  { %1359 = vsyncadd [#allocation3], 4294967168 }
  0x9a   :  { %1360 = dma.done.wait [#allocation6], 208  }
  0x9b   :  { %1361 = vsyncadd [#allocation6], 4294967088 }
  0x9c   :  { %1362 = dma.done.wait [#allocation9], 2080  }
  0x9d   :  { %1363 = vsyncadd [#allocation9], 4294965216 }
  0x9e   :  { %1364 = dma.done.wait [#allocation12], 4128  }
  0x9f   :  { %1365 = vsyncadd [#allocation12], 4294963168 }
  0xa0   :  { %1366 = dma.done.wait [#allocation15], 4128  }
  0xa1   :  { %1367 = vsyncadd [#allocation15], 4294963168  ;;  %v1383_v0 = vmov 0.0   ;;  %vm1384_vm0 = vmmov 0   ;;  %v1016_v1 = vld [vmem:[#allocation5] sm:$0xff]   ;;  %vm171_vm1 = vcmask 1040384  }
  0xa2   :  { %991 = vmatprep.subr.bf16.mxu0 %v1383_v0  ;;  %995 = vmatprep.mubr.msk.bf16.mxu0 %vm1384_vm0, %v1383_v0  ;;  %v1017_v2 = vld [vmem:[#allocation5 + $0x8] ss:$0 sps:$4 sm:$0x11]   ;;  %v146_v3 = vld [vmem:[#allocation2] sm:$0xff]  ;;  %v1021_v7 = vld [vmem:[#allocation8 + $0x14] ss:$8 sps:$4 sm:$0xff]  }
  0xa3   :  { %992 = vmatpush3.bf16.msra.mxu0 %v1016_v1  ;;  %v1018_v4 = vld [vmem:[#allocation8 + $0x4] ss:$8 sps:$4 sm:$0xff]   ;;  %v173_v5 = vsel %vm171_vm1, %v1017_v2, 0  ;;  %v1020_v6 = vld [vmem:[#allocation8] ss:$8 sps:$4 sm:$0xff]   ;;  %v147_v8 = vpack.c.bf16 %v146_v3, %v146_v3  ;;  %vm167_vm2 = vcmask 146432  }
  0xa4   :  { %993 = vmatprep.subr.bf16.mxu0 %v1383_v0  ;;  %327 = vmatprep.subr.bf16.mxu1 %v1018_v4  ;;  %v1023_v9 = vld [vmem:[#allocation8 + $0x10] ss:$8 sps:$4 sm:$0xff]   ;;  %v1024_v10 = vld [vmem:[#allocation8 + $0x24] ss:$8 sps:$4 sm:$0xff]   ;;  %v1026_v11 = vld [vmem:[#allocation8 + $0x20] ss:$8 sps:$4 sm:$0xff]  }
  0xa5   :  { %328 = vmatpush1.bf16.msra.mxu1 %v1020_v6  ;;  %v1027_v12 = vld [vmem:[#allocation8 + $0x34] ss:$8 sps:$4 sm:$0xff]   ;;  %v1029_v13 = vld [vmem:[#allocation8 + $0x30] ss:$8 sps:$4 sm:$0xff]   ;;  %v1030_v14 = vld [vmem:[#allocation8 + $0x44] ss:$8 sps:$4 sm:$0xff]  }
  0xa6   :  { %329 = vmatprep.subr.bf16.mxu1 %v1021_v7  ;;  %v1032_v15 = vld [vmem:[#allocation8 + $0x40] ss:$8 sps:$4 sm:$0xff]   ;;  %v1033_v16 = vld [vmem:[#allocation8 + $0x54] ss:$8 sps:$4 sm:$0xff]   ;;  %v1035_v17 = vld [vmem:[#allocation8 + $0x50] ss:$8 sps:$4 sm:$0xff]  }
  0xa7   :  { %994 = vmatpush3.bf16.msra.mxu0 %v173_v5  ;;  %v1036_v18 = vld [vmem:[#allocation8 + $0x64] ss:$8 sps:$4 sm:$0xff]   ;;  %v1038_v19 = vld [vmem:[#allocation8 + $0x60] ss:$8 sps:$4 sm:$0xff]   ;;  %v1039_v20 = vld [vmem:[#allocation8 + $0x74] ss:$8 sps:$4 sm:$0xff]  }
  0xa8   :  { %v1041_v21 = vld [vmem:[#allocation8 + $0x70] ss:$8 sps:$4 sm:$0xff]   ;;  %v1385_v22 = vmov 0   ;;  %v1042_v23 = vld [vmem:[#allocation11] ss:$8 sps:$4 sm:$0xff]   ;;  %s1386_s8 = smov [#allocation17]  }
  0xa9   :  { %330 = vmatpush1.bf16.msra.mxu1 %v1023_v9  ;;  %359 = vmatprep.mubr.bf16.mxu1 %v1385_v22  ;;  %v1044_v24 = vld [vmem:[#allocation11 + $0x4] ss:$8 sps:$4 sm:$0xff]   ;;  %v1047_v25 = vld [vmem:[#allocation11 + $0x14] ss:$8 sps:$4 sm:$0xff]   ;;  %v1045_v26 = vld [vmem:[#allocation11 + $0x10] ss:$8 sps:$4 sm:$0xff]  }
  0xaa   :  { %996 = vmatmul.mubr.msk.bf16.vlgmr.msra.gmra.mrb[0].mxu0 %vm167_vm2, %v147_v8  ;;  %331 = vmatprep.subr.bf16.mxu1 %v1024_v10  ;;  %v1050_v27 = vld [vmem:[#allocation11 + $0x24] ss:$8 sps:$4 sm:$0xff]   ;;  %v1048_v28 = vld [vmem:[#allocation11 + $0x20] ss:$8 sps:$4 sm:$0xff]   ;;  %v1053_v29 = vld [vmem:[#allocation11 + $0x34] ss:$8 sps:$4 sm:$0xff]  }
  0xab   :  { %580 = vmatprep.subr.bf16.mxu0 %v1044_v24  ;;  %v1051_v30 = vld [vmem:[#allocation11 + $0x30] ss:$8 sps:$4 sm:$0xff]   ;;  %v1056_v31 = vld [vmem:[#allocation11 + $0x44] ss:$8 sps:$4 sm:$0xff]   ;;  %v1054_v32 = vld [vmem:[#allocation11 + $0x40] ss:$8 sps:$4 sm:$0xff]  }
  0xac   :  { %581 = vmatpush1.bf16.msra.mxu0 %v1042_v23  ;;  %v1059_v33 = vld [vmem:[#allocation11 + $0x54] ss:$8 sps:$4 sm:$0xff]   ;;  %v1057_v34 = vld [vmem:[#allocation11 + $0x50] ss:$8 sps:$4 sm:$0xff]   ;;  %v1062_v35 = vld [vmem:[#allocation11 + $0x64] ss:$8 sps:$4 sm:$0xff]  }
  0xad   :  { %332 = vmatpush1.bf16.msra.mxu1 %v1026_v11  ;;  %582 = vmatprep.subr.bf16.mxu0 %v1047_v25  ;;  %v1060_v36 = vld [vmem:[#allocation11 + $0x60] ss:$8 sps:$4 sm:$0xff]   ;;  %v1065_v37 = vld [vmem:[#allocation11 + $0x74] ss:$8 sps:$4 sm:$0xff]   ;;  %v1063_v38 = vld [vmem:[#allocation11 + $0x70] ss:$8 sps:$4 sm:$0xff]  }
  0xae   :  { %333 = vmatprep.subr.bf16.mxu1 %v1027_v12  ;;  %v1068_v39 = vld [vmem:[#allocation11 + $0x84] ss:$8 sps:$4 sm:$0xff]   ;;  %v1066_v40 = vld [vmem:[#allocation11 + $0x80] ss:$8 sps:$4 sm:$0xff]   ;;  %v1071_v41 = vld [vmem:[#allocation11 + $0x94] ss:$8 sps:$4 sm:$0xff]  }
  0xaf   :  { %v1069_v42 = vld [vmem:[#allocation11 + $0x90] ss:$8 sps:$4 sm:$0xff]   ;;  %v1074_v43 = vld [vmem:[#allocation11 + $0xa4] ss:$8 sps:$4 sm:$0xff]   ;;  %v1072_v44 = vld [vmem:[#allocation11 + $0xa0] ss:$8 sps:$4 sm:$0xff]  }
  0xb0   :  { %583 = vmatpush1.bf16.msra.mxu0 %v1045_v26  ;;  %v1077_v45 = vld [vmem:[#allocation11 + $0xb4] ss:$8 sps:$4 sm:$0xff]   ;;  %v1075_v46 = vld [vmem:[#allocation11 + $0xb0] ss:$8 sps:$4 sm:$0xff]   ;;  %v1080_v47 = vld [vmem:[#allocation11 + $0xc4] ss:$8 sps:$4 sm:$0xff]  }
  0xb1   :  { %334 = vmatpush1.bf16.msra.mxu1 %v1029_v13  ;;  %584 = vmatprep.subr.bf16.mxu0 %v1050_v27  ;;  %v1078_v48 = vld [vmem:[#allocation11 + $0xc0] ss:$8 sps:$4 sm:$0xff]   ;;  %v1083_v49 = vld [vmem:[#allocation11 + $0xd4] ss:$8 sps:$4 sm:$0xff]   ;;  %v1081_v50 = vld [vmem:[#allocation11 + $0xd0] ss:$8 sps:$4 sm:$0xff]  }
  0xb2   :  { %335 = vmatprep.subr.bf16.mxu1 %v1030_v14  ;;  %v902_v51 = vld [vmem:[#allocation7] ss:$0 sm:$0xff]  ;;  %v1086_v60 = vld [vmem:[#allocation11 + $0xe4] ss:$8 sps:$4 sm:$0xff]   ;;  %v1084_v61 = vld [vmem:[#allocation11 + $0xe0] ss:$8 sps:$4 sm:$0xff]  }
  0xb3   :  { %v1089_v62 = vld [vmem:[#allocation11 + $0xf4] ss:$8 sps:$4 sm:$0xff]   ;;  %v1087_v63 = vld [vmem:[#allocation11 + $0xf0] ss:$8 sps:$4 sm:$0xff]   ;;  %v1090_v0 = vld [vmem:[#allocation14] ss:$8 sps:$4 sm:$0xff]  }
  0xb4   :  { %585 = vmatpush1.bf16.msra.mxu0 %v1048_v28  ;;  %v1092_v1 = vld [vmem:[#allocation14 + $0x4] ss:$8 sps:$4 sm:$0xff]   ;;  %v1095_v2 = vld [vmem:[#allocation14 + $0x14] ss:$8 sps:$4 sm:$0xff]   ;;  %v1093_v3 = vld [vmem:[#allocation14 + $0x10] ss:$8 sps:$4 sm:$0xff]   ;;  %v237_v28 = vlaneseq }
  0xb5   :  { %336 = vmatpush1.bf16.msra.mxu1 %v1032_v15  ;;  %586 = vmatprep.subr.bf16.mxu0 %v1053_v29  ;;  %v1098_v4 = vld [vmem:[#allocation14 + $0x24] ss:$8 sps:$4 sm:$0xff]   ;;  %v1096_v5 = vld [vmem:[#allocation14 + $0x20] ss:$8 sps:$4 sm:$0xff]   ;;  %v1101_v6 = vld [vmem:[#allocation14 + $0x34] ss:$8 sps:$4 sm:$0xff]  }
  0xb6   :  { %337 = vmatprep.subr.bf16.mxu1 %v1033_v16  ;;  %v1099_v7 = vld [vmem:[#allocation14 + $0x30] ss:$8 sps:$4 sm:$0xff]   ;;  %v1104_v8 = vld [vmem:[#allocation14 + $0x44] ss:$8 sps:$4 sm:$0xff]   ;;  %v1102_v9 = vld [vmem:[#allocation14 + $0x40] ss:$8 sps:$4 sm:$0xff]  }
  0xb7   :  { %v1107_v10 = vld [vmem:[#allocation14 + $0x54] ss:$8 sps:$4 sm:$0xff]   ;;  %v1105_v11 = vld [vmem:[#allocation14 + $0x50] ss:$8 sps:$4 sm:$0xff]   ;;  %v1110_v12 = vld [vmem:[#allocation14 + $0x64] ss:$8 sps:$4 sm:$0xff]  }
  0xb8   :  { %587 = vmatpush1.bf16.msra.mxu0 %v1051_v30  ;;  %v1108_v13 = vld [vmem:[#allocation14 + $0x60] ss:$8 sps:$4 sm:$0xff]   ;;  %v1113_v14 = vld [vmem:[#allocation14 + $0x74] ss:$8 sps:$4 sm:$0xff]   ;;  %v1111_v15 = vld [vmem:[#allocation14 + $0x70] ss:$8 sps:$4 sm:$0xff]  }
  0xb9   :  { %338 = vmatpush1.bf16.msra.mxu1 %v1035_v17  ;;  %588 = vmatprep.subr.bf16.mxu0 %v1056_v31  ;;  %v1116_v16 = vld [vmem:[#allocation14 + $0x84] ss:$8 sps:$4 sm:$0xff]   ;;  %v1114_v17 = vld [vmem:[#allocation14 + $0x80] ss:$8 sps:$4 sm:$0xff]   ;;  %v1125_v22 = vld [vmem:[#allocation14 + $0xb4] ss:$8 sps:$4 sm:$0xff]  }
  0xba   :  { %339 = vmatprep.subr.bf16.mxu1 %v1036_v18  ;;  %v1119_v18 = vld [vmem:[#allocation14 + $0x94] ss:$8 sps:$4 sm:$0xff]   ;;  %v1123_v23 = vld [vmem:[#allocation14 + $0xb0] ss:$8 sps:$4 sm:$0xff]   ;;  %v1128_v24 = vld [vmem:[#allocation14 + $0xc4] ss:$8 sps:$4 sm:$0xff]  }
  0xbb   :  { %v1126_v25 = vld [vmem:[#allocation14 + $0xc0] ss:$8 sps:$4 sm:$0xff]   ;;  %v1131_v26 = vld [vmem:[#allocation14 + $0xd4] ss:$8 sps:$4 sm:$0xff]   ;;  %v1129_v27 = vld [vmem:[#allocation14 + $0xd0] ss:$8 sps:$4 sm:$0xff]  }
  0xbc   :  { %589 = vmatpush1.bf16.msra.mxu0 %v1054_v32  ;;  %v238_v29 = vshrl.u32 %v237_v28, 7  ;;  %v235_v31 = vld [vmem:[#allocation10] sm:$0x3]  ;;  %s889_s26 = sshll.u32 %s1386_s8, 4  ;;  %s890_s26 = int_to_ptr.vmem [resolvable:$true] %s889_s26 }
  0xbd   :  { %340 = vmatpush1.bf16.msra.mxu1 %v1038_v19  ;;  %590 = vmatprep.subr.bf16.mxu0 %v1059_v33  ;;  %v1117_v19 = vld [vmem:[#allocation14 + $0x90] ss:$8 sps:$4 sm:$0xff]   ;;  %s1336_s3 = scalar_lea.vmem %s890_s26, 128  ;;  %p1341_p3 = scmp.lt.s32.totalorder %s890_s26, %s890_s26 }
  0xbe   :  { %341 = vmatprep.subr.bf16.mxu1 %v1039_v20  ;;  %v1122_v20 = vld [vmem:[#allocation14 + $0xa4] ss:$8 sps:$4 sm:$0xff]   ;;  %v239_v30 = vsub.s32 0, %v238_v29  ;;  %v243_v32 = vsub.s32 1, %v238_v29  ;;  %p1337_p2 = scmp.ne.s32.totalorder %s890_s26, %s1336_s3  ;;  %p1342_p4 = scmp.lt.s32.totalorder %s1336_s3, %s1336_s3 }
  0xc0   :  { %591 = vmatpush1.bf16.msra.mxu0 %v1057_v34  ;;  %v240_v33 = vrot.slane %v235_v31, %v239_v30  ;;  %v244_v34 = vrot.slane %v235_v31, %v243_v32  ;;  %p1343_p5 = por %p1342_p4, %p1341_p3 }
  0xc1   :  { %342 = vmatpush1.bf16.msra.mxu1 %v1041_v21  ;;  %592 = vmatprep.subr.bf16.mxu0 %v1062_v35  ;;  %v1120_v21 = vld [vmem:[#allocation14 + $0xa0] ss:$8 sps:$4 sm:$0xff]  }
  0xc2   :  { %833 = vmatprep.subr.bf16.mxu1 %v1092_v1  ;;  %p1344_p6 = pnand %p1343_p5, %p1337_p2 }
  0xc4   :  { %593 = vmatpush1.bf16.msra.mxu0 %v1060_v36 }
  0xc5   :  { %594 = vmatprep.subr.bf16.mxu0 %v1065_v37 }
  0xc8   :  { %595 = vmatpush1.bf16.msra.mxu0 %v1063_v38 }
  0xc9   :  { %596 = vmatprep.subr.bf16.mxu0 %v1068_v39 }
  0xcc   :  { %597 = vmatpush1.bf16.msra.mxu0 %v1066_v40 }
  0xcd   :  { %598 = vmatprep.subr.bf16.mxu0 %v1071_v41 }
  0xd0   :  { %599 = vmatpush1.bf16.msra.mxu0 %v1069_v42 }
  0xd1   :  { %600 = vmatprep.subr.bf16.mxu0 %v1074_v43 }
  0xd4   :  { %601 = vmatpush1.bf16.msra.mxu0 %v1072_v44 }
  0xd5   :  { %602 = vmatprep.subr.bf16.mxu0 %v1077_v45 }
  0xd8   :  { %603 = vmatpush1.bf16.msra.mxu0 %v1075_v46 }
  0xd9   :  { %604 = vmatprep.subr.bf16.mxu0 %v1080_v47  ;;  %v1134_v47 = vld [vmem:[#allocation14 + $0xe4] ss:$8 sps:$4 sm:$0xff]  }
  0xdc   :  { %605 = vmatpush1.bf16.msra.mxu0 %v1078_v48  ;;  %v1132_v48 = vld [vmem:[#allocation14 + $0xe0] ss:$8 sps:$4 sm:$0xff]  }
  0xdd   :  { %606 = vmatprep.subr.bf16.mxu0 %v1083_v49  ;;  %v1137_v49 = vld [vmem:[#allocation14 + $0xf4] ss:$8 sps:$4 sm:$0xff]  }
  0xe0   :  { %607 = vmatpush1.bf16.msra.mxu0 %v1081_v50  ;;  %v1135_v50 = vld [vmem:[#allocation14 + $0xf0] ss:$8 sps:$4 sm:$0xff]  }
  0xe1   :  { %608 = vmatprep.subr.bf16.mxu0 %v1086_v60 }
  0xe4   :  { %609 = vmatpush1.bf16.msra.mxu0 %v1084_v61 }
  0xe5   :  { %610 = vmatprep.subr.bf16.mxu0 %v1089_v62 }
  0xe8   :  { %611 = vmatpush1.bf16.msra.mxu0 %v1087_v63 }
 0x17d   :  { %v209_v52 = vpop.f32.mrb[0].mxu0 }
 0x17e   :  { %v210_v53 = vadd.f32 %v902_v51, %v209_v52  ;;  %v997_v54 = vpop.f32.mrb[1].mxu0  ;;  %v408_v51 = vld [vmem:[#allocation13] sm:$0x3] }
 0x17f   :  { %v212_v55 = vpop.f32.mrb[2].mxu0  ;;  %v413_v52 = vrot.slane %v408_v51, %v239_v30 }
 0x180   :  { %vm215_vm3 = vcmp.gt.f32.partialorder %v210_v53, 0.0  ;;  %v216_v56 = vmul.f32 0.01, %v210_v53  ;;  %v998_v57 = vpop.f32.mrb[3].mxu0 }
 0x182   :  { %v217_v58 = vsel %vm215_vm3, %v210_v53, %v216_v56  ;;  %v417_v53 = vrot.slane %v408_v51, %v243_v32 }
 0x183   :  { %v218_v59 = vpack.c.bf16 %v217_v58, %v217_v58 }
 0x185   :  { %360 = vmatmul.mubr.bf16.vlgmr.msra.gmra.mrb[0].mxu1 %v218_v59 }
 0x186   :  { %834 = vmatpush1.bf16.msra.mxu1 %v1090_v0 }
 0x187   :  { %835 = vmatprep.subr.bf16.mxu1 %v1095_v2  ;;  %v661_v2 = vld [vmem:[#allocation16] sm:$0x3] }
 0x18a   :  { %836 = vmatpush1.bf16.msra.mxu1 %v1093_v3  ;;  %v666_v3 = vrot.slane %v661_v2, %v239_v30 }
 0x18b   :  { %837 = vmatprep.subr.bf16.mxu1 %v1098_v4  ;;  %v670_v4 = vrot.slane %v661_v2, %v243_v32 }
 0x18e   :  { %838 = vmatpush1.bf16.msra.mxu1 %v1096_v5 }
 0x18f   :  { %839 = vmatprep.subr.bf16.mxu1 %v1101_v6 }
 0x192   :  { %840 = vmatpush1.bf16.msra.mxu1 %v1099_v7 }
 0x193   :  { %841 = vmatprep.subr.bf16.mxu1 %v1104_v8 }
 0x196   :  { %842 = vmatpush1.bf16.msra.mxu1 %v1102_v9 }
 0x197   :  { %843 = vmatprep.subr.bf16.mxu1 %v1107_v10 }
 0x19a   :  { %844 = vmatpush1.bf16.msra.mxu1 %v1105_v11 }
 0x19b   :  { %845 = vmatprep.subr.bf16.mxu1 %v1110_v12 }
 0x19e   :  { %846 = vmatpush1.bf16.msra.mxu1 %v1108_v13 }
 0x19f   :  { %847 = vmatprep.subr.bf16.mxu1 %v1113_v14 }
 0x1a2   :  { %848 = vmatpush1.bf16.msra.mxu1 %v1111_v15 }
 0x1a3   :  { %849 = vmatprep.subr.bf16.mxu1 %v1116_v16 }
 0x1a6   :  { %850 = vmatpush1.bf16.msra.mxu1 %v1114_v17 }
 0x1a7   :  { %851 = vmatprep.subr.bf16.mxu1 %v1119_v18 }
 0x1aa   :  { %852 = vmatpush1.bf16.msra.mxu1 %v1117_v19 }
 0x1ab   :  { %853 = vmatprep.subr.bf16.mxu1 %v1122_v20 }
 0x1ae   :  { %854 = vmatpush1.bf16.msra.mxu1 %v1120_v21 }
 0x1af   :  { %855 = vmatprep.subr.bf16.mxu1 %v1125_v22 }
 0x1b2   :  { %856 = vmatpush1.bf16.msra.mxu1 %v1123_v23 }
 0x1b3   :  { %857 = vmatprep.subr.bf16.mxu1 %v1128_v24 }
 0x1b6   :  { %858 = vmatpush1.bf16.msra.mxu1 %v1126_v25 }
 0x1b7   :  { %859 = vmatprep.subr.bf16.mxu1 %v1131_v26 }
 0x1ba   :  { %860 = vmatpush1.bf16.msra.mxu1 %v1129_v27 }
 0x1bb   :  { %861 = vmatprep.subr.bf16.mxu1 %v1134_v47 }
 0x1be   :  { %862 = vmatpush1.bf16.msra.mxu1 %v1132_v48 }
 0x1bf   :  { %863 = vmatprep.subr.bf16.mxu1 %v1137_v49 }
 0x1c2   :  { %864 = vmatpush1.bf16.msra.mxu1 %v1135_v50 }
 0x258   :  { %v361_v35 = vpop.f32.mrb[0].mxu1 }
 0x259   :  { %v362_v36 = vadd.f32 %v361_v35, %v240_v33  ;;  %v363_v37 = vpop.f32.mrb[1].mxu1 }
 0x25a   :  { %v364_v38 = vadd.f32 %v363_v37, %v244_v34  ;;  %v365_v39 = vpop.f32.mrb[2].mxu1 }
 0x25b   :  { %vm368_vm4 = vcmp.gt.f32.partialorder %v362_v36, 0.0  ;;  %v370_v40 = vmul.f32 0.01, %v362_v36  ;;  %v366_v41 = vpop.f32.mrb[3].mxu1 }
 0x25c   :  { %vm369_vm5 = vcmp.gt.f32.partialorder %v364_v38, 0.0  ;;  %v371_v42 = vmul.f32 0.01, %v364_v38 }
 0x25d   :  { %v372_v43 = vsel %vm368_vm4, %v362_v36, %v370_v40 }
 0x25e   :  { %v373_v44 = vsel %vm369_vm5, %v364_v38, %v371_v42  ;;  %v374_v46 = vpack.c.bf16 %v372_v43, %v372_v43 }
 0x25f   :  { %v375_v45 = vpack.c.bf16 %v373_v44, %v373_v44 }
 0x261   :  { %612 = vmatprep.mubr.bf16.mxu0 %v375_v45 }
 0x262   :  { %613 = vmatmul.mubr.bf16.vlgmr.msra.gmra.mrb[4].mxu0 %v374_v46 }
 0x335   :  { %v614_v54 = vpop.f32.mrb[4].mxu0 }
 0x336   :  { %v615_v55 = vadd.f32 %v614_v54, %v413_v52  ;;  %v616_v56 = vpop.f32.mrb[5].mxu0 }
 0x337   :  { %v617_v57 = vadd.f32 %v616_v56, %v417_v53  ;;  %v618_v58 = vpop.f32.mrb[6].mxu0 }
 0x338   :  { %vm621_vm6 = vcmp.gt.f32.partialorder %v615_v55, 0.0  ;;  %v623_v59 = vmul.f32 0.01, %v615_v55  ;;  %v619_v60 = vpop.f32.mrb[7].mxu0 }
 0x339   :  { %vm622_vm7 = vcmp.gt.f32.partialorder %v617_v57, 0.0  ;;  %v624_v61 = vmul.f32 0.01, %v617_v57 }
 0x33a   :  { %v625_v62 = vsel %vm621_vm6, %v615_v55, %v623_v59 }
 0x33b   :  { %v626_v63 = vsel %vm622_vm7, %v617_v57, %v624_v61  ;;  %v627_v1 = vpack.c.bf16 %v625_v62, %v625_v62 }
 0x33c   :  { %v628_v0 = vpack.c.bf16 %v626_v63, %v626_v63 }
 0x33e   :  { %865 = vmatprep.mubr.bf16.mxu1 %v628_v0 }
 0x33f   :  { %866 = vmatmul.mubr.bf16.vlgmr.msra.gmra.mrb[4].mxu1 %v627_v1 }
 0x412   :  { %v867_v5 = vpop.f32.mrb[4].mxu1 }
 0x413   :  { %v868_v6 = vadd.f32 %v867_v5, %v666_v3  ;;  %v869_v7 = vpop.f32.mrb[5].mxu1 }
 0x414   :  { %v870_v8 = vadd.f32 %v869_v7, %v670_v4  ;;  %v871_v9 = vpop.f32.mrb[6].mxu1 }
 0x415   :  { %v872_v10 = vpop.f32.mrb[7].mxu1 }
 0x416   :  { %v987_v11 = vpack.c.bf16 %v870_v8, %v868_v6 }
 0x418   :  { %882 = vst [vmem:[#allocation17] sm:$0xff] %v987_v11 }
 0x419   :  { %1347 = shalt.err (!%p1344_p6)
}
 0x41a   :  { %s1348_s2 = scalar_lea.hbm %s1582_s9, 128 }
 0x41b   :  { %p1349_p7 = scmp.ne.s32.totalorder %s1582_s9, %s1348_s2  ;;  %p1352_p8 = scmp.lt.u32.totalorder %s1348_s2, %s1582_s9 }
 0x41d   :  { %p1354_p9 = pnand %p1352_p8, %p1349_p7 }
 0x41f   :  { %1357 = shalt.err (!%p1354_p9)
}
 0x420   :  { %892 = dma.vmem_to_hbm [thread:$0]  %s890_s26, 128, %s1582_s9, [#allocation4]  }
 0x421   :  { %1368 = dma.done.wait [#allocation4], 128  }
 0x422   :  { %1369 = vsyncadd [#allocation4], 4294967168 }
 0x423   :  { %896 = vsyncpa [#allocation3], 1 }
 0x424   :  { %897 = vsyncpa [#allocation6], 1 }
 0x425   :  { %898 = vsyncpa [#allocation9], 1 }
 0x426   :  { %899 = vsyncpa [#allocation12], 1 }
 0x427   :  { %900 = vsyncpa [#allocation15], 1 }
 0x428   :  { %901 = vsyncpa [#allocation4], 1 }

</bundles_post_ra>
